<compile_context>
chip_gen: v6e
topology: v6e:2x2x1
jax: 0.10.0
libtpu: 0.0.40
codegen_flags: <defaults>
</compile_context>

<pallas_src>
import jax
import jax.numpy as jnp
from jax.experimental import pallas as pl
from jax.experimental.pallas import tpu as pltpu

_LANE = 128          # lane width / MXU alignment
_BATCH_ALIGN = 16    # sublane alignment for bf16-packed input tiles


def _round_up(x, m):
    return ((x + m - 1) // m) * m


def _device_kind():
    try:
        return jax.devices()[0].device_kind.lower()
    except Exception:
        return ""


def _vmem_capacity_bytes(kind):
    try:
        return int(pltpu.get_tpu_info().vmem_capacity_bytes)
    except Exception:
        pass
    if "v7" in kind:
        return 64 << 20      # v7x: 64 MiB per TensorCore
    return 128 << 20         # v5e / v6e


def _batch_tile_target(kind):
    # v6e/v7x MXUs are 2x256x256: M=256 fills the systolic height and halves
    # per-step pipeline overhead.  v5e (4x128x128) and unknown chips keep 128.
    if "v6" in kind or "v7" in kind:
        return 256
    return 128


def _mlp_abs_kernel(*refs):
    """refs = (x_ref, w0, b0, w1, b1, ..., w_{L-1}, b_{L-1}, o_ref).

    Layer 0 .. L-2 are Linear+ReLU, layer L-1 is Linear only; output = abs(.).
    x is bf16, weights are bf16 (in, out), biases f32 (1, out); accumulate f32.
    """
    x_ref = refs[0]
    o_ref = refs[-1]
    param_refs = refs[1:-1]
    n_linears = len(param_refs) // 2

    h = x_ref[...]                                  # bf16 tile straight to MXU
    for li in range(n_linears):
        w = param_refs[2 * li][...]                 # (K_pad, N_pad) bf16
        b = param_refs[2 * li + 1][...]             # (1, N_pad) f32, broadcasts
        h = jnp.dot(h.astype(w.dtype), w,
                    preferred_element_type=jnp.float32) + b
        if li < n_linears - 1:                      # final Linear has no ReLU
            h = jnp.maximum(h, 0.0)
    o_ref[...] = jnp.abs(h)                         # lane-dense padded store


def prepare_params(params, weight_dtype=jnp.bfloat16):
    """Zero-pad every Linear to 128-aligned dims, cast W to bf16, keep b in f32.

    params: list of (W, b) with W: (in, out) f32, b: (1, out) f32.
    Zero padding is exact: padded rows/cols contribute 0, ReLU(0)=0, bias pad 0.
    """
    prepared = []
    for w, b in params:
        kin, kout = int(w.shape[0]), int(w.shape[1])
        kin_p, kout_p = _round_up(kin, _LANE), _round_up(kout, _LANE)
        w_p = jnp.zeros((kin_p, kout_p), weight_dtype)
        w_p = w_p.at[:kin, :kout].set(w.astype(weight_dtype))
        b_p = jnp.zeros((1, kout_p), jnp.float32)
        b_p = b_p.at[:, :kout].set(b.astype(jnp.float32))
        prepared.append((w_p, b_p))
    return prepared


def critic_forward(x_nchw, prepared_params, out_dim):
    """Forward pass. prepared_params must come from prepare_params()."""
    batch = int(x_nchw.shape[0])
    x_flat = x_nchw.reshape(batch, -1)            # nn.Flatten
    in_dim = int(x_flat.shape[1])

    in_pad = int(prepared_params[0][0].shape[0])
    out_pad = int(prepared_params[-1][0].shape[1])

    kind = _device_kind()
    tb_target = _batch_tile_target(kind)
    vmem_cap = _vmem_capacity_bytes(kind)

    # Batch tiling: shrink the tile for small batches instead of padding to 128.
    b_pad = _round_up(max(batch, 1), _BATCH_ALIGN)
    if b_pad >= tb_target:
        tb = tb_target
        b_pad = _round_up(b_pad, tb)
    else:
        tb = b_pad
    # v7x has 2 TensorCores: prefer >=2 grid steps so "parallel" can shard them.
    if "v7" in kind and b_pad // tb == 1 and tb % (2 * _BATCH_ALIGN) == 0:
        tb //= 2
    grid = (b_pad // tb,)

    # bf16 cast fused with padding; skip the extra padding pass when aligned.
    x_bf16 = x_flat.astype(jnp.bfloat16)
    if batch == b_pad and in_dim == in_pad:
        x_p = x_bf16
    else:
        x_p = (jnp.zeros((b_pad, in_pad), jnp.bfloat16)
               .at[:batch, :in_dim].set(x_bf16))

    flat_args = [x_p]
    for w, b in prepared_params:
        flat_args += [w, b]

    def build_call(single_buffer_weights):
        const_map = lambda i: (0, 0)
        if single_buffer_weights:
            # Constant index_map -> no need for a second buffer of each weight.
            def const_spec(shape):
                return pl.BlockSpec(shape, const_map,
                                    pipeline_mode=pl.Buffered(1))
        else:
            def const_spec(shape):
                return pl.BlockSpec(shape, const_map)

        in_specs = [pl.BlockSpec((tb, in_pad), lambda i: (i, 0))]
        for w, b in prepared_params:
            in_specs += [const_spec(tuple(w.shape)), const_spec(tuple(b.shape))]
        out_spec = pl.BlockSpec((tb, out_pad), lambda i: (i, 0))

        # VMEM budget: double-buffered bf16 x tile + f32 out tile, resident
        # params (x1 if single-buffered, x2 otherwise), live f32 activations.
        act_cols = max([in_pad, out_pad]
                       + [int(w.shape[1]) for w, _ in prepared_params])
        wfac = 1 if single_buffer_weights else 2
        vmem_bytes = 2 * (tb * in_pad * 2 + tb * out_pad * 4)
        vmem_bytes += wfac * sum(w.size * w.dtype.itemsize + b.size * 4
                                 for w, b in prepared_params)
        vmem_bytes += 4 * tb * act_cols * 4
        vmem_bytes += 2 << 20
        cap = min(100 << 20, int(vmem_cap * 0.8))   # headroom below physical
        vmem_bytes = int(min(max(vmem_bytes, 8 << 20), cap))

        return pl.pallas_call(
            _mlp_abs_kernel,
            out_shape=jax.ShapeDtypeStruct((b_pad, out_pad), jnp.float32),
            grid=grid,
            in_specs=in_specs,
            out_specs=out_spec,
            compiler_params=pltpu.CompilerParams(
                dimension_semantics=("parallel",),
                vmem_limit_bytes=vmem_bytes),
        )

    try:
        out_padded = build_call(True)(*flat_args)
    except Exception:
        # Fallback if this JAX build rejects pipeline_mode on pallas_call specs.
        out_padded = build_call(False)(*flat_args)

    return out_padded[:batch, :out_dim]


def init_params(key, num_inputs, num_outputs, num_hidden_neurons,
                num_hidden_layers):
    """Mimics nn.Linear's U(-1/sqrt(fan_in), 1/sqrt(fan_in)) init.

    Returns list of (W, b) with W: (in, out) f32, b: (1, out) f32
    (W is transposed relative to PyTorch's (out, in) so y = x @ W + b).
    """
    dims = ([num_inputs]
            + [num_hidden_neurons] * (num_hidden_layers + 1)
            + [num_outputs])
    params = []
    for i in range(len(dims) - 1):
        fan_in, fan_out = dims[i], dims[i + 1]
        key, kw, kb = jax.random.split(key, 3)
        bound = 1.0 / (fan_in ** 0.5)
        w = jax.random.uniform(kw, (fan_in, fan_out), jnp.float32,
                               minval=-bound, maxval=bound)
        b = jax.random.uniform(kb, (1, fan_out), jnp.float32,
                               minval=-bound, maxval=bound)
        params.append((w, b))
    return params


def reference_forward_bf16(x_nchw, params, weight_dtype=jnp.bfloat16):
    """Plain-JAX reference using the same bf16-weight / f32-accumulate math."""
    h = x_nchw.astype(jnp.float32).reshape(x_nchw.shape[0], -1)
    for i, (w, b) in enumerate(params):
        h = jnp.dot(h.astype(weight_dtype), w.astype(weight_dtype),
                    preferred_element_type=jnp.float32) + b.astype(jnp.float32)
        if i < len(params) - 1:
            h = jnp.maximum(h, 0.0)
    return jnp.abs(h)


def reference_forward_f32(x_nchw, params):
    """Full-precision reference matching the PyTorch module exactly."""
    h = x_nchw.astype(jnp.float32).reshape(x_nchw.shape[0], -1)
    for i, (w, b) in enumerate(params):
        h = h @ w + b
        if i < len(params) - 1:
            h = jnp.maximum(h, 0.0)
    return jnp.abs(h)


if __name__ == "__main__":
    key = jax.random.PRNGKey(0)

    # Small shapes consistent with the module: batch=2, flattened input 4*2*2=16,
    # hidden=32, 2 hidden layers, critic output dim = 1.
    batch, C, H, W = 2, 4, 2, 2
    num_inputs = C * H * W            # 16 after Flatten
    num_outputs = 1
    num_hidden_neurons = 32
    num_hidden_layers = 2

    k_x, k_p = jax.random.split(key)
    x = jax.random.normal(k_x, (batch, C, H, W), jnp.float32)
    params = init_params(k_p, num_inputs, num_outputs,
                         num_hidden_neurons, num_hidden_layers)
    prepared = prepare_params(params)   # pad + bf16 cast done once, outside the call

    y = critic_forward(x, prepared, num_outputs)
    y = jax.block_until_ready(y)

    # Check against a reference doing the same bf16-weight / f32-accumulate math.
    y_ref_bf16 = reference_forward_bf16(x, params)
    # And against the exact f32 PyTorch-equivalent math (bf16 rounding only).
    y_ref_f32 = reference_forward_f32(x, params)

    assert y.shape == (batch, num_outputs), y.shape
    assert jnp.allclose(y, y_ref_bf16, atol=1e-3, rtol=1e-3), (y, y_ref_bf16)
    assert jnp.allclose(y, y_ref_f32, atol=2e-2, rtol=5e-2), (y, y_ref_f32)
    assert bool(jnp.all(y >= 0.0))    # abs() semantics

    print("KERNEL_OK")
</pallas_src>

<mosaic_0001>
module attributes {stable_mosaic.version = 11 : i64} {
  func.func @_mlp_abs_kernel(%arg0: i32, %arg1: memref<16x128xbf16, #tpu.memory_space<vmem>>, %arg2: memref<128x128xbf16, #tpu.memory_space<vmem>>, %arg3: memref<1x128xf32, #tpu.memory_space<vmem>>, %arg4: memref<128x128xbf16, #tpu.memory_space<vmem>>, %arg5: memref<1x128xf32, #tpu.memory_space<vmem>>, %arg6: memref<128x128xbf16, #tpu.memory_space<vmem>>, %arg7: memref<1x128xf32, #tpu.memory_space<vmem>>, %arg8: memref<128x128xbf16, #tpu.memory_space<vmem>>, %arg9: memref<1x128xf32, #tpu.memory_space<vmem>>, %arg10: memref<16x128xf32, #tpu.memory_space<vmem>>) attributes {dimension_semantics = [#tpu.dimension_semantics<parallel>], iteration_bounds = array<i64: 1>, scalar_prefetch = 0 : i64, scratch_operands = 0 : i64, tpu.core_type = #tpu.core_type<tc>, window_params = [{transform_indices = @transform_0, window_bounds = array<i64: 16, 128>}, {pipeline_mode = #tpu.pipeline_mode<synchronous>, transform_indices = @transform_1, window_bounds = array<i64: 128, 128>}, {pipeline_mode = #tpu.pipeline_mode<synchronous>, transform_indices = @transform_2, window_bounds = array<i64: 1, 128>}, {pipeline_mode = #tpu.pipeline_mode<synchronous>, transform_indices = @transform_3, window_bounds = array<i64: 128, 128>}, {pipeline_mode = #tpu.pipeline_mode<synchronous>, transform_indices = @transform_4, window_bounds = array<i64: 1, 128>}, {pipeline_mode = #tpu.pipeline_mode<synchronous>, transform_indices = @transform_5, window_bounds = array<i64: 128, 128>}, {pipeline_mode = #tpu.pipeline_mode<synchronous>, transform_indices = @transform_6, window_bounds = array<i64: 1, 128>}, {pipeline_mode = #tpu.pipeline_mode<synchronous>, transform_indices = @transform_7, window_bounds = array<i64: 128, 128>}, {pipeline_mode = #tpu.pipeline_mode<synchronous>, transform_indices = @transform_8, window_bounds = array<i64: 1, 128>}, {transform_indices = @transform_9, window_bounds = array<i64: 16, 128>}]} {
    %c0 = arith.constant 0 : index
    %c0_0 = arith.constant 0 : index
    %0 = vector.load %arg1[%c0, %c0_0] : memref<16x128xbf16, #tpu.memory_space<vmem>>, vector<16x128xbf16>
    %c0_1 = arith.constant 0 : index
    %c0_2 = arith.constant 0 : index
    %1 = vector.load %arg2[%c0_1, %c0_2] : memref<128x128xbf16, #tpu.memory_space<vmem>>, vector<128x128xbf16>
    %c0_3 = arith.constant 0 : index
    %c0_4 = arith.constant 0 : index
    %2 = vector.load %arg3[%c0_3, %c0_4] : memref<1x128xf32, #tpu.memory_space<vmem>>, vector<1x128xf32>
    %cst = arith.constant dense<0.000000e+00> : vector<16x128xf32>
    %3 = tpu.matmul %0, %1, %cst {dimension_numbers = #tpu.dot_dimension_numbers<[1], [0], [0], [1], [0, 0, 1, 1], [], []>} : vector<16x128xbf16>, vector<128x128xbf16>, vector<16x128xf32> -> vector<16x128xf32>
    %4 = vector.broadcast %2 : vector<1x128xf32> to vector<16x128xf32>
    %5 = arith.addf %3, %4 : vector<16x128xf32>
    %cst_5 = arith.constant 0.000000e+00 : f32
    %6 = vector.broadcast %cst_5 : f32 to vector<16x128xf32>
    %7 = arith.maximumf %5, %6 : vector<16x128xf32>
    %c0_6 = arith.constant 0 : index
    %c0_7 = arith.constant 0 : index
    %8 = vector.load %arg4[%c0_6, %c0_7] : memref<128x128xbf16, #tpu.memory_space<vmem>>, vector<128x128xbf16>
    %c0_8 = arith.constant 0 : index
    %c0_9 = arith.constant 0 : index
    %9 = vector.load %arg5[%c0_8, %c0_9] : memref<1x128xf32, #tpu.memory_space<vmem>>, vector<1x128xf32>
    %10 = arith.truncf %7 : vector<16x128xf32> to vector<16x128xbf16>
    %cst_10 = arith.constant dense<0.000000e+00> : vector<16x128xf32>
    %11 = tpu.matmul %10, %8, %cst_10 {dimension_numbers = #tpu.dot_dimension_numbers<[1], [0], [0], [1], [0, 0, 1, 1], [], []>} : vector<16x128xbf16>, vector<128x128xbf16>, vector<16x128xf32> -> vector<16x128xf32>
    %12 = vector.broadcast %9 : vector<1x128xf32> to vector<16x128xf32>
    %13 = arith.addf %11, %12 : vector<16x128xf32>
    %cst_11 = arith.constant 0.000000e+00 : f32
    %14 = vector.broadcast %cst_11 : f32 to vector<16x128xf32>
    %15 = arith.maximumf %13, %14 : vector<16x128xf32>
    %c0_12 = arith.constant 0 : index
    %c0_13 = arith.constant 0 : index
    %16 = vector.load %arg6[%c0_12, %c0_13] : memref<128x128xbf16, #tpu.memory_space<vmem>>, vector<128x128xbf16>
    %c0_14 = arith.constant 0 : index
    %c0_15 = arith.constant 0 : index
    %17 = vector.load %arg7[%c0_14, %c0_15] : memref<1x128xf32, #tpu.memory_space<vmem>>, vector<1x128xf32>
    %18 = arith.truncf %15 : vector<16x128xf32> to vector<16x128xbf16>
    %cst_16 = arith.constant dense<0.000000e+00> : vector<16x128xf32>
    %19 = tpu.matmul %18, %16, %cst_16 {dimension_numbers = #tpu.dot_dimension_numbers<[1], [0], [0], [1], [0, 0, 1, 1], [], []>} : vector<16x128xbf16>, vector<128x128xbf16>, vector<16x128xf32> -> vector<16x128xf32>
    %20 = vector.broadcast %17 : vector<1x128xf32> to vector<16x128xf32>
    %21 = arith.addf %19, %20 : vector<16x128xf32>
    %cst_17 = arith.constant 0.000000e+00 : f32
    %22 = vector.broadcast %cst_17 : f32 to vector<16x128xf32>
    %23 = arith.maximumf %21, %22 : vector<16x128xf32>
    %c0_18 = arith.constant 0 : index
    %c0_19 = arith.constant 0 : index
    %24 = vector.load %arg8[%c0_18, %c0_19] : memref<128x128xbf16, #tpu.memory_space<vmem>>, vector<128x128xbf16>
    %c0_20 = arith.constant 0 : index
    %c0_21 = arith.constant 0 : index
    %25 = vector.load %arg9[%c0_20, %c0_21] : memref<1x128xf32, #tpu.memory_space<vmem>>, vector<1x128xf32>
    %26 = arith.truncf %23 : vector<16x128xf32> to vector<16x128xbf16>
    %cst_22 = arith.constant dense<0.000000e+00> : vector<16x128xf32>
    %27 = tpu.matmul %26, %24, %cst_22 {dimension_numbers = #tpu.dot_dimension_numbers<[1], [0], [0], [1], [0, 0, 1, 1], [], []>} : vector<16x128xbf16>, vector<128x128xbf16>, vector<16x128xf32> -> vector<16x128xf32>
    %28 = vector.broadcast %25 : vector<1x128xf32> to vector<16x128xf32>
    %29 = arith.addf %27, %28 : vector<16x128xf32>
    %30 = math.absf %29 : vector<16x128xf32>
    %c0_23 = arith.constant 0 : index
    %c0_24 = arith.constant 0 : index
    %31 = vector.load %arg10[%c0_23, %c0_24] : memref<16x128xf32, #tpu.memory_space<vmem>>, vector<16x128xf32>
    tpu.vector_store %arg10[%c0_23, %c0_24], %30 {strides = array<i32>} : memref<16x128xf32, #tpu.memory_space<vmem>>, vector<16x128xf32>,
    return
  }
  func.func @transform_0(%arg0: i32) -> (i32, i32) {
    %c0_i32 = arith.constant 0 : i32
    %c0_i32_0 = arith.constant 0 : i32
    return %arg0, %c0_i32 : i32, i32
  }
  func.func @transform_1(%arg0: i32) -> (i32, i32) {
    %c0_i32 = arith.constant 0 : i32
    %c0_i32_0 = arith.constant 0 : i32
    %c0_i32_1 = arith.constant 0 : i32
    return %c0_i32, %c0_i32_0 : i32, i32
  }
  func.func @transform_2(%arg0: i32) -> (i32, i32) {
    %c0_i32 = arith.constant 0 : i32
    %c0_i32_0 = arith.constant 0 : i32
    %c0_i32_1 = arith.constant 0 : i32
    return %c0_i32, %c0_i32_0 : i32, i32
  }
  func.func @transform_3(%arg0: i32) -> (i32, i32) {
    %c0_i32 = arith.constant 0 : i32
    %c0_i32_0 = arith.constant 0 : i32
    %c0_i32_1 = arith.constant 0 : i32
    return %c0_i32, %c0_i32_0 : i32, i32
  }
  func.func @transform_4(%arg0: i32) -> (i32, i32) {
    %c0_i32 = arith.constant 0 : i32
    %c0_i32_0 = arith.constant 0 : i32
    %c0_i32_1 = arith.constant 0 : i32
    return %c0_i32, %c0_i32_0 : i32, i32
  }
  func.func @transform_5(%arg0: i32) -> (i32, i32) {
    %c0_i32 = arith.constant 0 : i32
    %c0_i32_0 = arith.constant 0 : i32
    %c0_i32_1 = arith.constant 0 : i32
    return %c0_i32, %c0_i32_0 : i32, i32
  }
  func.func @transform_6(%arg0: i32) -> (i32, i32) {
    %c0_i32 = arith.constant 0 : i32
    %c0_i32_0 = arith.constant 0 : i32
    %c0_i32_1 = arith.constant 0 : i32
    return %c0_i32, %c0_i32_0 : i32, i32
  }
  func.func @transform_7(%arg0: i32) -> (i32, i32) {
    %c0_i32 = arith.constant 0 : i32
    %c0_i32_0 = arith.constant 0 : i32
    %c0_i32_1 = arith.constant 0 : i32
    return %c0_i32, %c0_i32_0 : i32, i32
  }
  func.func @transform_8(%arg0: i32) -> (i32, i32) {
    %c0_i32 = arith.constant 0 : i32
    %c0_i32_0 = arith.constant 0 : i32
    %c0_i32_1 = arith.constant 0 : i32
    return %c0_i32, %c0_i32_0 : i32, i32
  }
  func.func @transform_9(%arg0: i32) -> (i32, i32) {
    %c0_i32 = arith.constant 0 : i32
    %c0_i32_0 = arith.constant 0 : i32
    return %arg0, %c0_i32 : i32, i32
  }
}

module attributes {stable_mosaic.version = 11 : i64} {
  func.func @_mlp_abs_kernel(%arg0: i32, %arg1: memref<16x128xbf16, #tpu.memory_space<vmem>>, %arg2: memref<128x128xbf16, #tpu.memory_space<vmem>>, %arg3: memref<1x128xf32, #tpu.memory_space<vmem>>, %arg4: memref<128x128xbf16, #tpu.memory_space<vmem>>, %arg5: memref<1x128xf32, #tpu.memory_space<vmem>>, %arg6: memref<128x128xbf16, #tpu.memory_space<vmem>>, %arg7: memref<1x128xf32, #tpu.memory_space<vmem>>, %arg8: memref<128x128xbf16, #tpu.memory_space<vmem>>, %arg9: memref<1x128xf32, #tpu.memory_space<vmem>>, %arg10: memref<16x128xf32, #tpu.memory_space<vmem>>) attributes {dimension_semantics = [#tpu.dimension_semantics<parallel>], iteration_bounds = array<i64: 1>, scalar_prefetch = 0 : i64, scratch_operands = 0 : i64, tpu.core_type = #tpu.core_type<tc>, window_params = [{transform_indices = @transform_0, window_bounds = array<i64: 16, 128>}, {pipeline_mode = #tpu.pipeline_mode<synchronous>, transform_indices = @transform_1, window_bounds = array<i64: 128, 128>}, {pipeline_mode = #tpu.pipeline_mode<synchronous>, transform_indices = @transform_2, window_bounds = array<i64: 1, 128>}, {pipeline_mode = #tpu.pipeline_mode<synchronous>, transform_indices = @transform_3, window_bounds = array<i64: 128, 128>}, {pipeline_mode = #tpu.pipeline_mode<synchronous>, transform_indices = @transform_4, window_bounds = array<i64: 1, 128>}, {pipeline_mode = #tpu.pipeline_mode<synchronous>, transform_indices = @transform_5, window_bounds = array<i64: 128, 128>}, {pipeline_mode = #tpu.pipeline_mode<synchronous>, transform_indices = @transform_6, window_bounds = array<i64: 1, 128>}, {pipeline_mode = #tpu.pipeline_mode<synchronous>, transform_indices = @transform_7, window_bounds = array<i64: 128, 128>}, {pipeline_mode = #tpu.pipeline_mode<synchronous>, transform_indices = @transform_8, window_bounds = array<i64: 1, 128>}, {transform_indices = @transform_9, window_bounds = array<i64: 16, 128>}]} {
    %c0 = arith.constant 0 : index
    %c0_0 = arith.constant 0 : index
    %0 = vector.load %arg1[%c0, %c0_0] : memref<16x128xbf16, #tpu.memory_space<vmem>>, vector<16x128xbf16>
    %c0_1 = arith.constant 0 : index
    %c0_2 = arith.constant 0 : index
    %1 = vector.load %arg2[%c0_1, %c0_2] : memref<128x128xbf16, #tpu.memory_space<vmem>>, vector<128x128xbf16>
    %c0_3 = arith.constant 0 : index
    %c0_4 = arith.constant 0 : index
    %2 = vector.load %arg3[%c0_3, %c0_4] : memref<1x128xf32, #tpu.memory_space<vmem>>, vector<1x128xf32>
    %cst = arith.constant dense<0.000000e+00> : vector<16x128xf32>
    %3 = tpu.matmul %0, %1, %cst {dimension_numbers = #tpu.dot_dimension_numbers<[1], [0], [0], [1], [0, 0, 1, 1], [], []>} : vector<16x128xbf16>, vector<128x128xbf16>, vector<16x128xf32> -> vector<16x128xf32>
    %4 = vector.broadcast %2 : vector<1x128xf32> to vector<16x128xf32>
    %5 = arith.addf %3, %4 : vector<16x128xf32>
    %cst_5 = arith.constant 0.000000e+00 : f32
    %6 = vector.broadcast %cst_5 : f32 to vector<16x128xf32>
    %7 = arith.maximumf %5, %6 : vector<16x128xf32>
    %c0_6 = arith.constant 0 : index
    %c0_7 = arith.constant 0 : index
    %8 = vector.load %arg4[%c0_6, %c0_7] : memref<128x128xbf16, #tpu.memory_space<vmem>>, vector<128x128xbf16>
    %c0_8 = arith.constant 0 : index
    %c0_9 = arith.constant 0 : index
    %9 = vector.load %arg5[%c0_8, %c0_9] : memref<1x128xf32, #tpu.memory_space<vmem>>, vector<1x128xf32>
    %10 = arith.truncf %7 : vector<16x128xf32> to vector<16x128xbf16>
    %cst_10 = arith.constant dense<0.000000e+00> : vector<16x128xf32>
    %11 = tpu.matmul %10, %8, %cst_10 {dimension_numbers = #tpu.dot_dimension_numbers<[1], [0], [0], [1], [0, 0, 1, 1], [], []>} : vector<16x128xbf16>, vector<128x128xbf16>, vector<16x128xf32> -> vector<16x128xf32>
    %12 = vector.broadcast %9 : vector<1x128xf32> to vector<16x128xf32>
    %13 = arith.addf %11, %12 : vector<16x128xf32>
    %cst_11 = arith.constant 0.000000e+00 : f32
    %14 = vector.broadcast %cst_11 : f32 to vector<16x128xf32>
    %15 = arith.maximumf %13, %14 : vector<16x128xf32>
    %c0_12 = arith.constant 0 : index
    %c0_13 = arith.constant 0 : index
    %16 = vector.load %arg6[%c0_12, %c0_13] : memref<128x128xbf16, #tpu.memory_space<vmem>>, vector<128x128xbf16>
    %c0_14 = arith.constant 0 : index
    %c0_15 = arith.constant 0 : index
    %17 = vector.load %arg7[%c0_14, %c0_15] : memref<1x128xf32, #tpu.memory_space<vmem>>, vector<1x128xf32>
    %18 = arith.truncf %15 : vector<16x128xf32> to vector<16x128xbf16>
    %cst_16 = arith.constant dense<0.000000e+00> : vector<16x128xf32>
    %19 = tpu.matmul %18, %16, %cst_16 {dimension_numbers = #tpu.dot_dimension_numbers<[1], [0], [0], [1], [0, 0, 1, 1], [], []>} : vector<16x128xbf16>, vector<128x128xbf16>, vector<16x128xf32> -> vector<16x128xf32>
    %20 = vector.broadcast %17 : vector<1x128xf32> to vector<16x128xf32>
    %21 = arith.addf %19, %20 : vector<16x128xf32>
    %cst_17 = arith.constant 0.000000e+00 : f32
    %22 = vector.broadcast %cst_17 : f32 to vector<16x128xf32>
    %23 = arith.maximumf %21, %22 : vector<16x128xf32>
    %c0_18 = arith.constant 0 : index
    %c0_19 = arith.constant 0 : index
    %24 = vector.load %arg8[%c0_18, %c0_19] : memref<128x128xbf16, #tpu.memory_space<vmem>>, vector<128x128xbf16>
    %c0_20 = arith.constant 0 : index
    %c0_21 = arith.constant 0 : index
    %25 = vector.load %arg9[%c0_20, %c0_21] : memref<1x128xf32, #tpu.memory_space<vmem>>, vector<1x128xf32>
    %26 = arith.truncf %23 : vector<16x128xf32> to vector<16x128xbf16>
    %cst_22 = arith.constant dense<0.000000e+00> : vector<16x128xf32>
    %27 = tpu.matmul %26, %24, %cst_22 {dimension_numbers = #tpu.dot_dimension_numbers<[1], [0], [0], [1], [0, 0, 1, 1], [], []>} : vector<16x128xbf16>, vector<128x128xbf16>, vector<16x128xf32> -> vector<16x128xf32>
    %28 = vector.broadcast %25 : vector<1x128xf32> to vector<16x128xf32>
    %29 = arith.addf %27, %28 : vector<16x128xf32>
    %30 = math.absf %29 : vector<16x128xf32>
    %c0_23 = arith.constant 0 : index
    %c0_24 = arith.constant 0 : index
    %31 = vector.load %arg10[%c0_23, %c0_24] : memref<16x128xf32, #tpu.memory_space<vmem>>, vector<16x128xf32>
    tpu.vector_store %arg10[%c0_23, %c0_24], %30 {strides = array<i32>} : memref<16x128xf32, #tpu.memory_space<vmem>>, vector<16x128xf32>,
    return
  }
  func.func @transform_0(%arg0: i32) -> (i32, i32) {
    %c0_i32 = arith.constant 0 : i32
    %c0_i32_0 = arith.constant 0 : i32
    return %arg0, %c0_i32 : i32, i32
  }
  func.func @transform_1(%arg0: i32) -> (i32, i32) {
    %c0_i32 = arith.constant 0 : i32
    %c0_i32_0 = arith.constant 0 : i32
    %c0_i32_1 = arith.constant 0 : i32
    return %c0_i32, %c0_i32_0 : i32, i32
  }
  func.func @transform_2(%arg0: i32) -> (i32, i32) {
    %c0_i32 = arith.constant 0 : i32
    %c0_i32_0 = arith.constant 0 : i32
    %c0_i32_1 = arith.constant 0 : i32
    return %c0_i32, %c0_i32_0 : i32, i32
  }
  func.func @transform_3(%arg0: i32) -> (i32, i32) {
    %c0_i32 = arith.constant 0 : i32
    %c0_i32_0 = arith.constant 0 : i32
    %c0_i32_1 = arith.constant 0 : i32
    return %c0_i32, %c0_i32_0 : i32, i32
  }
  func.func @transform_4(%arg0: i32) -> (i32, i32) {
    %c0_i32 = arith.constant 0 : i32
    %c0_i32_0 = arith.constant 0 : i32
    %c0_i32_1 = arith.constant 0 : i32
    return %c0_i32, %c0_i32_0 : i32, i32
  }
  func.func @transform_5(%arg0: i32) -> (i32, i32) {
    %c0_i32 = arith.constant 0 : i32
    %c0_i32_0 = arith.constant 0 : i32
    %c0_i32_1 = arith.constant 0 : i32
    return %c0_i32, %c0_i32_0 : i32, i32
  }
  func.func @transform_6(%arg0: i32) -> (i32, i32) {
    %c0_i32 = arith.constant 0 : i32
    %c0_i32_0 = arith.constant 0 : i32
    %c0_i32_1 = arith.constant 0 : i32
    return %c0_i32, %c0_i32_0 : i32, i32
  }
  func.func @transform_7(%arg0: i32) -> (i32, i32) {
    %c0_i32 = arith.constant 0 : i32
    %c0_i32_0 = arith.constant 0 : i32
    %c0_i32_1 = arith.constant 0 : i32
    return %c0_i32, %c0_i32_0 : i32, i32
  }
  func.func @transform_8(%arg0: i32) -> (i32, i32) {
    %c0_i32 = arith.constant 0 : i32
    %c0_i32_0 = arith.constant 0 : i32
    %c0_i32_1 = arith.constant 0 : i32
    return %c0_i32, %c0_i32_0 : i32, i32
  }
  func.func @transform_9(%arg0: i32) -> (i32, i32) {
    %c0_i32 = arith.constant 0 : i32
    %c0_i32_0 = arith.constant 0 : i32
    return %arg0, %c0_i32 : i32, i32
  }
}

</mosaic_0001>

<bundles_post_ra>
// kernel: tpu_custom_call.1
= control target key start
LH: loop header
LB: loop body
LE: loop exit
PB: predicated region body
PF: predicated region fallthrough
CT: control target
= control target key end

     0   :  { %14 = vsyncpa [#allocation3], 0  ;;  %s1063_s0 = inlined_call_operand.hbm [shape: bf16[16,128], index: 0, kind: input, shape index: {}]   ;;  %s1064_s1 = inlined_call_operand.hbm [shape: bf16[128,128], index: 1, kind: input, shape index: {}]   ;;  %s1065_s2 = inlined_call_operand.vmem [shape: f32[1,128], index: 2, kind: input, shape index: {}]   ;;  %s1066_s3 = inlined_call_operand.hbm [shape: bf16[128,128], index: 3, kind: input, shape index: {}]   ;;  %s1067_s4 = inlined_call_operand.vmem [shape: f32[1,128], index: 4, kind: input, shape index: {}]   ;;  %s1068_s5 = inlined_call_operand.hbm [shape: bf16[128,128], index: 5, kind: input, shape index: {}]   ;;  %s1069_s6 = inlined_call_operand.vmem [shape: f32[1,128], index: 6, kind: input, shape index: {}]   ;;  %s1070_s7 = inlined_call_operand.hbm [shape: bf16[128,128], index: 7, kind: input, shape index: {}]   ;;  %s1071_s8 = inlined_call_operand.vmem [shape: f32[1,128], index: 8, kind: input, shape index: {}]   ;;  %s1072_s9 = inlined_call_operand.hbm [shape: f32[16,128], index: 9, kind: output, shape index: {}]  }
   0x1   :  { %15 = vsyncpa [#allocation6], 0 }
   0x2   :  { %16 = vsyncpa [#allocation9], 0 }
   0x3   :  { %17 = vsyncpa [#allocation4], 0  ;;  %s916_s30 = smov [#allocation5]   ;;  %s917_s11 = smov [#allocation8]  }
   0x4   :  { %s35_s10 = sshll.u32 %s916_s30, 4  ;;  %s63_s12 = sshll.u32 %s917_s11, 4  ;;  %s36_s10 = int_to_ptr.vmem [resolvable:$true] %s35_s10  ;;  %s64_s12 = int_to_ptr.vmem [resolvable:$true] %s63_s12 }
   0x5   :  { %s796_s13 = scalar_lea.vmem %s36_s10, 1024  ;;  %p801_p1 = scmp.lt.s32.totalorder %s36_s10, %s36_s10 }
   0x6   :  { %p797_p0 = scmp.ne.s32.totalorder %s36_s10, %s796_s13  ;;  %p802_p2 = scmp.lt.s32.totalorder %s796_s13, %s796_s13 }
   0x8   :  { %p803_p3 = por %p802_p2, %p801_p1 }
   0xa   :  { %p804_p4 = pnand %p803_p3, %p797_p0 }
   0xc   :  { %807 = shalt.err (!%p804_p4)
}
   0xd   :  { %s918_s14 = smov 64   ;;  %s919_s15 = smov 4  }
   0xe   :  { %41 = dma.hbm_to_vmem [thread:$0]  %s1064_s1, 1024, %s36_s10, [#allocation6], %s918_s14, %s918_s14, %s919_s15  }
   0xf   :  { %s816_s18 = scalar_lea.vmem %s64_s12, 1024  ;;  %p821_p6 = scmp.lt.s32.totalorder %s64_s12, %s64_s12 }
  0x10   :  { %p817_p5 = scmp.ne.s32.totalorder %s64_s12, %s816_s18  ;;  %p822_p7 = scmp.lt.s32.totalorder %s816_s18, %s816_s18 }
  0x12   :  { %p823_p8 = por %p822_p7, %p821_p6 }
  0x14   :  { %p824_p9 = pnand %p823_p8, %p817_p5 }
  0x16   :  { %827 = shalt.err (!%p824_p9)
}
  0x17   :  { %69 = dma.hbm_to_vmem [thread:$0]  %s1068_s5, 1024, %s64_s12, [#allocation9], %s918_s14, %s918_s14, %s919_s15  }
  0x18   :  { %s920_s21 = smov [#allocation2]   ;;  %s921_s23 = smov [#allocation7]  }
  0x19   :  { %s23_s22 = sshll.u32 %s920_s21, 4  ;;  %s49_s24 = sshll.u32 %s921_s23, 4  ;;  %s24_s22 = int_to_ptr.vmem [resolvable:$true] %s23_s22  ;;  %s50_s24 = int_to_ptr.vmem [resolvable:$true] %s49_s24 }
  0x1a   :  { %s836_s1 = scalar_lea.vmem %s24_s22, 128  ;;  %p841_p11 = scmp.lt.s32.totalorder %s24_s22, %s24_s22 }
  0x1b   :  { %p837_p10 = scmp.ne.s32.totalorder %s24_s22, %s836_s1  ;;  %p842_p12 = scmp.lt.s32.totalorder %s836_s1, %s836_s1 }
  0x1d   :  { %p843_p13 = por %p842_p12, %p841_p11 }
  0x1f   :  { %p844_p0 = pnand %p843_p13, %p837_p10 }
  0x21   :  { %847 = shalt.err (!%p844_p0)
}
  0x22   :  { %29 = dma.hbm_to_vmem [thread:$0]  %s1063_s0, 128, %s24_s22, [#allocation3], %s918_s14, %s918_s14, %s919_s15  }
  0x23   :  { %s856_s5 = scalar_lea.vmem %s50_s24, 1024  ;;  %p861_p2 = scmp.lt.s32.totalorder %s50_s24, %s50_s24 }
  0x24   :  { %p857_p1 = scmp.ne.s32.totalorder %s50_s24, %s856_s5  ;;  %p862_p3 = scmp.lt.s32.totalorder %s856_s5, %s856_s5 }
  0x26   :  { %p863_p4 = por %p862_p3, %p861_p2 }
  0x28   :  { %p864_p5 = pnand %p863_p4, %p857_p1 }
  0x2a   :  { %867 = shalt.err (!%p864_p5)
}
  0x2b   :  { %55 = dma.hbm_to_vmem [thread:$0]  %s1066_s3, 1024, %s50_s24, [#allocation6], %s918_s14, %s918_s14, %s919_s15  }
  0x2c   :  { %s922_s29 = smov [#allocation10]  }
  0x2d   :  { %s77_s30 = sshll.u32 %s922_s29, 4  ;;  %s78_s30 = int_to_ptr.vmem [resolvable:$true] %s77_s30 }
  0x2e   :  { %s876_s10 = scalar_lea.vmem %s78_s30, 1024  ;;  %p881_p7 = scmp.lt.s32.totalorder %s78_s30, %s78_s30 }
  0x2f   :  { %p877_p6 = scmp.ne.s32.totalorder %s78_s30, %s876_s10  ;;  %p882_p8 = scmp.lt.s32.totalorder %s876_s10, %s876_s10 }
  0x31   :  { %p883_p9 = por %p882_p8, %p881_p7 }
  0x33   :  { %p884_p10 = pnand %p883_p9, %p877_p6 }
  0x35   :  { %887 = shalt.err (!%p884_p10)
}
  0x36   :  { %83 = dma.hbm_to_vmem [thread:$0]  %s1070_s7, 1024, %s78_s30, [#allocation9], %s918_s14, %s918_s14, %s919_s15  }
  0x37   :  { %908 = dma.done.wait [#allocation3], 128  }
  0x38   :  { %909 = vsyncadd [#allocation3], 4294967168 }
  0x39   :  { %910 = dma.done.wait [#allocation6], 2048  }
  0x3a   :  { %911 = vsyncadd [#allocation6], 4294965248 }
  0x3b   :  { %912 = dma.done.wait [#allocation9], 2048  }
  0x3c   :  { %913 = vsyncadd [#allocation9], 4294965248  ;;  %v923_v0 = vmov 0.0   ;;  %vm924_vm0 = vmmov 0   ;;  %v755_v1 = vld [vmem:[#allocation5 + $0x38] sm:$0xff]   ;;  %v756_v2 = vld [vmem:[#allocation5 + $0x30] sm:$0xff]  }
  0x3d   :  { %663 = vmatprep.subr.bf16.mxu0 %v923_v0  ;;  %679 = vmatprep.mubr.msk.bf16.mxu0 %vm924_vm0, %v923_v0  ;;  %v757_v3 = vld [vmem:[#allocation5 + $0x28] sm:$0xff]   ;;  %v764_v4 = vld [vmem:[#allocation7 + $0x38] sm:$0xff]   ;;  %v758_v5 = vld [vmem:[#allocation5 + $0x20] sm:$0xff]   ;;  %s925_s16 = smov [#allocation11]  }
  0x3e   :  { %683 = vmatprep.subr.bf16.mxu1 %v923_v0  ;;  %699 = vmatprep.mubr.msk.bf16.mxu1 %vm924_vm0, %v923_v0  ;;  %v765_v6 = vld [vmem:[#allocation7 + $0x30] sm:$0xff]   ;;  %v759_v7 = vld [vmem:[#allocation5 + $0x18] sm:$0xff]   ;;  %v766_v8 = vld [vmem:[#allocation7 + $0x28] sm:$0xff]  }
  0x3f   :  { %664 = vmatpush3.bf16.msra.mxu0 %v755_v1  ;;  %684 = vmatpush3.bf16.msra.mxu1 %v764_v4  ;;  %v760_v9 = vld [vmem:[#allocation5 + $0x10] sm:$0xff]   ;;  %v767_v10 = vld [vmem:[#allocation7 + $0x20] sm:$0xff]   ;;  %v761_v11 = vld [vmem:[#allocation5 + $0x8] sm:$0xff]  }
  0x40   :  { %665 = vmatprep.subr.bf16.mxu0 %v923_v0  ;;  %685 = vmatprep.subr.bf16.mxu1 %v923_v0  ;;  %v768_v12 = vld [vmem:[#allocation7 + $0x18] sm:$0xff]   ;;  %v762_v13 = vld [vmem:[#allocation5] sm:$0xff]   ;;  %v769_v15 = vld [vmem:[#allocation7 + $0x10] sm:$0xff]  }
  0x41   :  { %v763_v14 = vld [vmem:[#allocation2] sm:$0xff]   ;;  %v770_v16 = vld [vmem:[#allocation7 + $0x8] sm:$0xff]   ;;  %v771_v17 = vld [vmem:[#allocation7] sm:$0xff]  }
  0x42   :  { %v772_v18 = vld [vmem:[#allocation8 + $0x38] sm:$0xff]   ;;  %v773_v19 = vld [vmem:[#allocation8 + $0x30] sm:$0xff]   ;;  %v774_v20 = vld [vmem:[#allocation8 + $0x28] sm:$0xff]  }
  0x43   :  { %666 = vmatpush3.bf16.msra.mxu0 %v756_v2  ;;  %686 = vmatpush3.bf16.msra.mxu1 %v765_v6  ;;  %v775_v21 = vld [vmem:[#allocation8 + $0x20] sm:$0xff]   ;;  %v776_v22 = vld [vmem:[#allocation8 + $0x18] sm:$0xff]   ;;  %v777_v33 = vld [vmem:[#allocation8 + $0x10] sm:$0xff]  }
  0x44   :  { %667 = vmatprep.subr.bf16.mxu0 %v923_v0  ;;  %687 = vmatprep.subr.bf16.mxu1 %v923_v0  ;;  %v590_v23 = vld [vmem:[%s1065_s2] ss:$0 sm:$0xff]  ;;  %v778_v34 = vld [vmem:[#allocation8 + $0x8] sm:$0xff]   ;;  %v779_v35 = vld [vmem:[#allocation8] sm:$0xff]  }
  0x45   :  { %v780_v36 = vld [vmem:[#allocation10 + $0x38] sm:$0xff]   ;;  %v781_v37 = vld [vmem:[#allocation10 + $0x30] sm:$0xff]   ;;  %v782_v38 = vld [vmem:[#allocation10 + $0x28] sm:$0xff]  }
  0x46   :  { %v783_v39 = vld [vmem:[#allocation10 + $0x20] sm:$0xff]   ;;  %v784_v40 = vld [vmem:[#allocation10 + $0x18] sm:$0xff]   ;;  %v785_v51 = vld [vmem:[#allocation10 + $0x10] sm:$0xff]  }
  0x47   :  { %668 = vmatpush3.bf16.msra.mxu0 %v757_v3  ;;  %688 = vmatpush3.bf16.msra.mxu1 %v766_v8  ;;  %v600_v41 = vld [vmem:[%s1067_s4] ss:$0 sm:$0xff]  ;;  %v786_v52 = vld [vmem:[#allocation10 + $0x8] sm:$0xff]   ;;  %v787_v53 = vld [vmem:[#allocation10] sm:$0xff]  }
  0x48   :  { %669 = vmatprep.subr.bf16.mxu0 %v923_v0  ;;  %689 = vmatprep.subr.bf16.mxu1 %v923_v0  ;;  %v609_v54 = vld [vmem:[%s1069_s6] ss:$0 sm:$0xff]  ;;  %s576_s6 = sshll.u32 %s925_s16, 4  ;;  %s577_s6 = int_to_ptr.vmem [resolvable:$true] %s576_s6 }
  0x49   :  { %s888_s17 = scalar_lea.vmem %s577_s6, 256  ;;  %p893_p12 = scmp.lt.s32.totalorder %s577_s6, %s577_s6 }
  0x4a   :  { %p889_p11 = scmp.ne.s32.totalorder %s577_s6, %s888_s17  ;;  %p894_p13 = scmp.lt.s32.totalorder %s888_s17, %s888_s17 }
  0x4b   :  { %670 = vmatpush3.bf16.msra.mxu0 %v758_v5  ;;  %690 = vmatpush3.bf16.msra.mxu1 %v767_v10 }
  0x4c   :  { %671 = vmatprep.subr.bf16.mxu0 %v923_v0  ;;  %691 = vmatprep.subr.bf16.mxu1 %v923_v0  ;;  %p895_p0 = por %p894_p13, %p893_p12 }
  0x4e   :  { %p896_p1 = pnand %p895_p0, %p889_p11 }
  0x4f   :  { %672 = vmatpush3.bf16.msra.mxu0 %v759_v7  ;;  %692 = vmatpush3.bf16.msra.mxu1 %v768_v12 }
  0x50   :  { %673 = vmatprep.subr.bf16.mxu0 %v923_v0  ;;  %693 = vmatprep.subr.bf16.mxu1 %v923_v0 }
  0x53   :  { %674 = vmatpush3.bf16.msra.mxu0 %v760_v9  ;;  %694 = vmatpush3.bf16.msra.mxu1 %v769_v15 }
  0x54   :  { %675 = vmatprep.subr.bf16.mxu0 %v923_v0  ;;  %695 = vmatprep.subr.bf16.mxu1 %v923_v0 }
  0x57   :  { %676 = vmatpush3.bf16.msra.mxu0 %v761_v11  ;;  %696 = vmatpush3.bf16.msra.mxu1 %v770_v16 }
  0x58   :  { %677 = vmatprep.subr.bf16.mxu0 %v923_v0  ;;  %697 = vmatprep.subr.bf16.mxu1 %v923_v0 }
  0x5b   :  { %678 = vmatpush3.bf16.msra.mxu0 %v762_v13  ;;  %698 = vmatpush3.bf16.msra.mxu1 %v771_v17 }
  0x5c   :  { %703 = vmatprep.subr.bf16.mxu0 %v923_v0  ;;  %723 = vmatprep.subr.bf16.mxu1 %v923_v0 }
  0x5e   :  { %680 = vmatmul.mubr.bf16.vlgmr.msra.gmra.mxu0 %v763_v14 }
  0x5f   :  { %719 = vmatprep.mubr.msk.bf16.mxu0 %vm924_vm0, %v923_v0  ;;  %704 = vmatpush3.bf16.msra.mxu0 %v772_v18 }
  0x60   :  { %705 = vmatprep.subr.bf16.mxu0 %v923_v0 }
  0x63   :  { %706 = vmatpush3.bf16.msra.mxu0 %v773_v19 }
  0x64   :  { %707 = vmatprep.subr.bf16.mxu0 %v923_v0 }
  0x67   :  { %708 = vmatpush3.bf16.msra.mxu0 %v774_v20 }
  0x68   :  { %709 = vmatprep.subr.bf16.mxu0 %v923_v0 }
  0x6b   :  { %710 = vmatpush3.bf16.msra.mxu0 %v775_v21 }
  0x6c   :  { %711 = vmatprep.subr.bf16.mxu0 %v923_v0 }
  0x6f   :  { %712 = vmatpush3.bf16.msra.mxu0 %v776_v22 }
  0x70   :  { %713 = vmatprep.subr.bf16.mxu0 %v923_v0 }
  0x73   :  { %714 = vmatpush3.bf16.msra.mxu0 %v777_v33 }
  0x74   :  { %715 = vmatprep.subr.bf16.mxu0 %v923_v0 }
  0x77   :  { %716 = vmatpush3.bf16.msra.mxu0 %v778_v34 }
  0x78   :  { %717 = vmatprep.subr.bf16.mxu0 %v923_v0 }
  0x7b   :  { %718 = vmatpush3.bf16.msra.mxu0 %v779_v35 }
 0x11e   :  { %v215_v24 = vpop.f32.mrf.mxu0 }
 0x11f   :  { %v216_v26 = vadd.f32 %v590_v23, %v215_v24 }
 0x120   :  { %v681_v25 = vpop.f32.mrf.mxu0 }
 0x121   :  { %v222_v30 = vmax.f32 %v216_v26, 0.0 }
 0x122   :  { %v218_v27 = vpop.f32.mrf.mxu0 }
 0x123   :  { %v219_v28 = vadd.f32 %v590_v23, %v218_v27 }
 0x124   :  { %v682_v29 = vpop.f32.mrf.mxu0 }
 0x125   :  { %v223_v31 = vmax.f32 %v219_v28, 0.0 }
 0x127   :  { %v241_v32 = vpack.c.bf16 %v223_v31, %v222_v30 }
 0x129   :  { %700 = vmatmul.mubr.bf16.vlgmr.msra.gmra.mxu1 %v241_v32 }
 0x12a   :  { %739 = vmatprep.mubr.msk.bf16.mxu1 %vm924_vm0, %v923_v0  ;;  %724 = vmatpush3.bf16.msra.mxu1 %v780_v36 }
 0x12b   :  { %725 = vmatprep.subr.bf16.mxu1 %v923_v0 }
 0x12e   :  { %726 = vmatpush3.bf16.msra.mxu1 %v781_v37 }
 0x12f   :  { %727 = vmatprep.subr.bf16.mxu1 %v923_v0 }
 0x132   :  { %728 = vmatpush3.bf16.msra.mxu1 %v782_v38 }
 0x133   :  { %729 = vmatprep.subr.bf16.mxu1 %v923_v0 }
 0x136   :  { %730 = vmatpush3.bf16.msra.mxu1 %v783_v39 }
 0x137   :  { %731 = vmatprep.subr.bf16.mxu1 %v923_v0 }
 0x13a   :  { %732 = vmatpush3.bf16.msra.mxu1 %v784_v40 }
 0x13b   :  { %733 = vmatprep.subr.bf16.mxu1 %v923_v0 }
 0x13e   :  { %734 = vmatpush3.bf16.msra.mxu1 %v785_v51 }
 0x13f   :  { %735 = vmatprep.subr.bf16.mxu1 %v923_v0 }
 0x142   :  { %736 = vmatpush3.bf16.msra.mxu1 %v786_v52 }
 0x143   :  { %737 = vmatprep.subr.bf16.mxu1 %v923_v0  ;;  %v618_v0 = vld [vmem:[%s1071_s8] ss:$0 sm:$0xff] }
 0x146   :  { %738 = vmatpush3.bf16.msra.mxu1 %v787_v53 }
 0x1e9   :  { %v330_v42 = vpop.f32.mrf.mxu1 }
 0x1ea   :  { %v331_v44 = vadd.f32 %v600_v41, %v330_v42 }
 0x1eb   :  { %v701_v43 = vpop.f32.mrf.mxu1 }
 0x1ec   :  { %v337_v48 = vmax.f32 %v331_v44, 0.0 }
 0x1ed   :  { %v333_v45 = vpop.f32.mrf.mxu1 }
 0x1ee   :  { %v334_v46 = vadd.f32 %v600_v41, %v333_v45 }
 0x1ef   :  { %v702_v47 = vpop.f32.mrf.mxu1 }
 0x1f0   :  { %v338_v49 = vmax.f32 %v334_v46, 0.0 }
 0x1f2   :  { %v356_v50 = vpack.c.bf16 %v338_v49, %v337_v48 }
 0x1f4   :  { %720 = vmatmul.mubr.bf16.vlgmr.msra.gmra.mxu0 %v356_v50 }
 0x2b4   :  { %v445_v55 = vpop.f32.mrf.mxu0 }
 0x2b5   :  { %v446_v57 = vadd.f32 %v609_v54, %v445_v55 }
 0x2b6   :  { %v721_v56 = vpop.f32.mrf.mxu0 }
 0x2b7   :  { %v452_v61 = vmax.f32 %v446_v57, 0.0 }
 0x2b8   :  { %v448_v58 = vpop.f32.mrf.mxu0 }
 0x2b9   :  { %v449_v59 = vadd.f32 %v609_v54, %v448_v58 }
 0x2ba   :  { %v722_v60 = vpop.f32.mrf.mxu0 }
 0x2bb   :  { %v453_v62 = vmax.f32 %v449_v59, 0.0 }
 0x2bd   :  { %v471_v63 = vpack.c.bf16 %v453_v62, %v452_v61 }
 0x2bf   :  { %740 = vmatmul.mubr.bf16.vlgmr.msra.gmra.mxu1 %v471_v63 }
 0x37f   :  { %v560_v1 = vpop.f32.mrf.mxu1 }
 0x380   :  { %v561_v2 = vadd.f32 %v618_v0, %v560_v1 }
 0x381   :  { %v741_v3 = vpop.f32.mrf.mxu1 }
 0x382   :  { %v567_v4 = vand.u32 2147483647, %v561_v2 }
 0x383   :  { %v563_v5 = vpop.f32.mrf.mxu1 }
 0x384   :  { %569 = vst [vmem:[#allocation11] sm:$0xff] %v567_v4  ;;  %v564_v6 = vadd.f32 %v618_v0, %v563_v5 }
 0x385   :  { %v742_v7 = vpop.f32.mrf.mxu1 }
 0x386   :  { %v568_v8 = vand.u32 2147483647, %v564_v6 }
 0x388   :  { %570 = vst [vmem:[#allocation11 + $0x8] sm:$0xff] %v568_v8 }
 0x389   :  { %899 = shalt.err (!%p896_p1)
}
 0x38a   :  { %s926_s8 = smov 128   ;;  %s927_s18 = smov 8  }
 0x38b   :  { %582 = dma.vmem_to_hbm [thread:$0]  %s577_s6, 256, %s1072_s9, [#allocation4], %s926_s8, %s926_s8, %s927_s18  }
 0x38c   :  { %914 = dma.done.wait [#allocation4], 256  }
 0x38d   :  { %915 = vsyncadd [#allocation4], 4294967040 }
 0x38e   :  { %586 = vsyncpa [#allocation3], 1 }
 0x38f   :  { %587 = vsyncpa [#allocation6], 1 }
 0x390   :  { %588 = vsyncpa [#allocation9], 1 }
 0x391   :  { %589 = vsyncpa [#allocation4], 1 }

// kernel: tpu_custom_call.1
= control target key start
LH: loop header
LB: loop body
LE: loop exit
PB: predicated region body
PF: predicated region fallthrough
CT: control target
= control target key end

     0   :  { %14 = vsyncpa [#allocation3], 0  ;;  %s1063_s0 = inlined_call_operand.hbm [shape: bf16[16,128], index: 0, kind: input, shape index: {}]   ;;  %s1064_s1 = inlined_call_operand.hbm [shape: bf16[128,128], index: 1, kind: input, shape index: {}]   ;;  %s1065_s2 = inlined_call_operand.vmem [shape: f32[1,128], index: 2, kind: input, shape index: {}]   ;;  %s1066_s3 = inlined_call_operand.hbm [shape: bf16[128,128], index: 3, kind: input, shape index: {}]   ;;  %s1067_s4 = inlined_call_operand.vmem [shape: f32[1,128], index: 4, kind: input, shape index: {}]   ;;  %s1068_s5 = inlined_call_operand.hbm [shape: bf16[128,128], index: 5, kind: input, shape index: {}]   ;;  %s1069_s6 = inlined_call_operand.vmem [shape: f32[1,128], index: 6, kind: input, shape index: {}]   ;;  %s1070_s7 = inlined_call_operand.hbm [shape: bf16[128,128], index: 7, kind: input, shape index: {}]   ;;  %s1071_s8 = inlined_call_operand.vmem [shape: f32[1,128], index: 8, kind: input, shape index: {}]   ;;  %s1072_s9 = inlined_call_operand.hbm [shape: f32[16,128], index: 9, kind: output, shape index: {}]  }
   0x1   :  { %15 = vsyncpa [#allocation6], 0 }
   0x2   :  { %16 = vsyncpa [#allocation9], 0 }
   0x3   :  { %17 = vsyncpa [#allocation4], 0  ;;  %s916_s30 = smov [#allocation5]   ;;  %s917_s11 = smov [#allocation8]  }
   0x4   :  { %s35_s10 = sshll.u32 %s916_s30, 4  ;;  %s63_s12 = sshll.u32 %s917_s11, 4  ;;  %s36_s10 = int_to_ptr.vmem [resolvable:$true] %s35_s10  ;;  %s64_s12 = int_to_ptr.vmem [resolvable:$true] %s63_s12 }
   0x5   :  { %s796_s13 = scalar_lea.vmem %s36_s10, 1024  ;;  %p801_p1 = scmp.lt.s32.totalorder %s36_s10, %s36_s10 }
   0x6   :  { %p797_p0 = scmp.ne.s32.totalorder %s36_s10, %s796_s13  ;;  %p802_p2 = scmp.lt.s32.totalorder %s796_s13, %s796_s13 }
   0x8   :  { %p803_p3 = por %p802_p2, %p801_p1 }
   0xa   :  { %p804_p4 = pnand %p803_p3, %p797_p0 }
   0xc   :  { %807 = shalt.err (!%p804_p4)
}
   0xd   :  { %s918_s14 = smov 64   ;;  %s919_s15 = smov 4  }
   0xe   :  { %41 = dma.hbm_to_vmem [thread:$0]  %s1064_s1, 1024, %s36_s10, [#allocation6], %s918_s14, %s918_s14, %s919_s15  }
   0xf   :  { %s816_s18 = scalar_lea.vmem %s64_s12, 1024  ;;  %p821_p6 = scmp.lt.s32.totalorder %s64_s12, %s64_s12 }
  0x10   :  { %p817_p5 = scmp.ne.s32.totalorder %s64_s12, %s816_s18  ;;  %p822_p7 = scmp.lt.s32.totalorder %s816_s18, %s816_s18 }
  0x12   :  { %p823_p8 = por %p822_p7, %p821_p6 }
  0x14   :  { %p824_p9 = pnand %p823_p8, %p817_p5 }
  0x16   :  { %827 = shalt.err (!%p824_p9)
}
  0x17   :  { %69 = dma.hbm_to_vmem [thread:$0]  %s1068_s5, 1024, %s64_s12, [#allocation9], %s918_s14, %s918_s14, %s919_s15  }
  0x18   :  { %s920_s21 = smov [#allocation2]   ;;  %s921_s23 = smov [#allocation7]  }
  0x19   :  { %s23_s22 = sshll.u32 %s920_s21, 4  ;;  %s49_s24 = sshll.u32 %s921_s23, 4  ;;  %s24_s22 = int_to_ptr.vmem [resolvable:$true] %s23_s22  ;;  %s50_s24 = int_to_ptr.vmem [resolvable:$true] %s49_s24 }
  0x1a   :  { %s836_s1 = scalar_lea.vmem %s24_s22, 128  ;;  %p841_p11 = scmp.lt.s32.totalorder %s24_s22, %s24_s22 }
  0x1b   :  { %p837_p10 = scmp.ne.s32.totalorder %s24_s22, %s836_s1  ;;  %p842_p12 = scmp.lt.s32.totalorder %s836_s1, %s836_s1 }
  0x1d   :  { %p843_p13 = por %p842_p12, %p841_p11 }
  0x1f   :  { %p844_p0 = pnand %p843_p13, %p837_p10 }
  0x21   :  { %847 = shalt.err (!%p844_p0)
}
  0x22   :  { %29 = dma.hbm_to_vmem [thread:$0]  %s1063_s0, 128, %s24_s22, [#allocation3], %s918_s14, %s918_s14, %s919_s15  }
  0x23   :  { %s856_s5 = scalar_lea.vmem %s50_s24, 1024  ;;  %p861_p2 = scmp.lt.s32.totalorder %s50_s24, %s50_s24 }
  0x24   :  { %p857_p1 = scmp.ne.s32.totalorder %s50_s24, %s856_s5  ;;  %p862_p3 = scmp.lt.s32.totalorder %s856_s5, %s856_s5 }
  0x26   :  { %p863_p4 = por %p862_p3, %p861_p2 }
  0x28   :  { %p864_p5 = pnand %p863_p4, %p857_p1 }
  0x2a   :  { %867 = shalt.err (!%p864_p5)
}
  0x2b   :  { %55 = dma.hbm_to_vmem [thread:$0]  %s1066_s3, 1024, %s50_s24, [#allocation6], %s918_s14, %s918_s14, %s919_s15  }
  0x2c   :  { %s922_s29 = smov [#allocation10]  }
  0x2d   :  { %s77_s30 = sshll.u32 %s922_s29, 4  ;;  %s78_s30 = int_to_ptr.vmem [resolvable:$true] %s77_s30 }
  0x2e   :  { %s876_s10 = scalar_lea.vmem %s78_s30, 1024  ;;  %p881_p7 = scmp.lt.s32.totalorder %s78_s30, %s78_s30 }
  0x2f   :  { %p877_p6 = scmp.ne.s32.totalorder %s78_s30, %s876_s10  ;;  %p882_p8 = scmp.lt.s32.totalorder %s876_s10, %s876_s10 }
  0x31   :  { %p883_p9 = por %p882_p8, %p881_p7 }
  0x33   :  { %p884_p10 = pnand %p883_p9, %p877_p6 }
  0x35   :  { %887 = shalt.err (!%p884_p10)
}
  0x36   :  { %83 = dma.hbm_to_vmem [thread:$0]  %s1070_s7, 1024, %s78_s30, [#allocation9], %s918_s14, %s918_s14, %s919_s15  }
  0x37   :  { %908 = dma.done.wait [#allocation3], 128  }
  0x38   :  { %909 = vsyncadd [#allocation3], 4294967168 }
  0x39   :  { %910 = dma.done.wait [#allocation6], 2048  }
  0x3a   :  { %911 = vsyncadd [#allocation6], 4294965248 }
  0x3b   :  { %912 = dma.done.wait [#allocation9], 2048  }
  0x3c   :  { %913 = vsyncadd [#allocation9], 4294965248  ;;  %v923_v0 = vmov 0.0   ;;  %vm924_vm0 = vmmov 0   ;;  %v755_v1 = vld [vmem:[#allocation5 + $0x38] sm:$0xff]   ;;  %v756_v2 = vld [vmem:[#allocation5 + $0x30] sm:$0xff]  }
  0x3d   :  { %663 = vmatprep.subr.bf16.mxu0 %v923_v0  ;;  %679 = vmatprep.mubr.msk.bf16.mxu0 %vm924_vm0, %v923_v0  ;;  %v757_v3 = vld [vmem:[#allocation5 + $0x28] sm:$0xff]   ;;  %v764_v4 = vld [vmem:[#allocation7 + $0x38] sm:$0xff]   ;;  %v758_v5 = vld [vmem:[#allocation5 + $0x20] sm:$0xff]   ;;  %s925_s16 = smov [#allocation11]  }
  0x3e   :  { %683 = vmatprep.subr.bf16.mxu1 %v923_v0  ;;  %699 = vmatprep.mubr.msk.bf16.mxu1 %vm924_vm0, %v923_v0  ;;  %v765_v6 = vld [vmem:[#allocation7 + $0x30] sm:$0xff]   ;;  %v759_v7 = vld [vmem:[#allocation5 + $0x18] sm:$0xff]   ;;  %v766_v8 = vld [vmem:[#allocation7 + $0x28] sm:$0xff]  }
  0x3f   :  { %664 = vmatpush3.bf16.msra.mxu0 %v755_v1  ;;  %684 = vmatpush3.bf16.msra.mxu1 %v764_v4  ;;  %v760_v9 = vld [vmem:[#allocation5 + $0x10] sm:$0xff]   ;;  %v767_v10 = vld [vmem:[#allocation7 + $0x20] sm:$0xff]   ;;  %v761_v11 = vld [vmem:[#allocation5 + $0x8] sm:$0xff]  }
  0x40   :  { %665 = vmatprep.subr.bf16.mxu0 %v923_v0  ;;  %685 = vmatprep.subr.bf16.mxu1 %v923_v0  ;;  %v768_v12 = vld [vmem:[#allocation7 + $0x18] sm:$0xff]   ;;  %v762_v13 = vld [vmem:[#allocation5] sm:$0xff]   ;;  %v769_v15 = vld [vmem:[#allocation7 + $0x10] sm:$0xff]  }
  0x41   :  { %v763_v14 = vld [vmem:[#allocation2] sm:$0xff]   ;;  %v770_v16 = vld [vmem:[#allocation7 + $0x8] sm:$0xff]   ;;  %v771_v17 = vld [vmem:[#allocation7] sm:$0xff]  }
  0x42   :  { %v772_v18 = vld [vmem:[#allocation8 + $0x38] sm:$0xff]   ;;  %v773_v19 = vld [vmem:[#allocation8 + $0x30] sm:$0xff]   ;;  %v774_v20 = vld [vmem:[#allocation8 + $0x28] sm:$0xff]  }
  0x43   :  { %666 = vmatpush3.bf16.msra.mxu0 %v756_v2  ;;  %686 = vmatpush3.bf16.msra.mxu1 %v765_v6  ;;  %v775_v21 = vld [vmem:[#allocation8 + $0x20] sm:$0xff]   ;;  %v776_v22 = vld [vmem:[#allocation8 + $0x18] sm:$0xff]   ;;  %v777_v33 = vld [vmem:[#allocation8 + $0x10] sm:$0xff]  }
  0x44   :  { %667 = vmatprep.subr.bf16.mxu0 %v923_v0  ;;  %687 = vmatprep.subr.bf16.mxu1 %v923_v0  ;;  %v590_v23 = vld [vmem:[%s1065_s2] ss:$0 sm:$0xff]  ;;  %v778_v34 = vld [vmem:[#allocation8 + $0x8] sm:$0xff]   ;;  %v779_v35 = vld [vmem:[#allocation8] sm:$0xff]  }
  0x45   :  { %v780_v36 = vld [vmem:[#allocation10 + $0x38] sm:$0xff]   ;;  %v781_v37 = vld [vmem:[#allocation10 + $0x30] sm:$0xff]   ;;  %v782_v38 = vld [vmem:[#allocation10 + $0x28] sm:$0xff]  }
  0x46   :  { %v783_v39 = vld [vmem:[#allocation10 + $0x20] sm:$0xff]   ;;  %v784_v40 = vld [vmem:[#allocation10 + $0x18] sm:$0xff]   ;;  %v785_v51 = vld [vmem:[#allocation10 + $0x10] sm:$0xff]  }
  0x47   :  { %668 = vmatpush3.bf16.msra.mxu0 %v757_v3  ;;  %688 = vmatpush3.bf16.msra.mxu1 %v766_v8  ;;  %v600_v41 = vld [vmem:[%s1067_s4] ss:$0 sm:$0xff]  ;;  %v786_v52 = vld [vmem:[#allocation10 + $0x8] sm:$0xff]   ;;  %v787_v53 = vld [vmem:[#allocation10] sm:$0xff]  }
  0x48   :  { %669 = vmatprep.subr.bf16.mxu0 %v923_v0  ;;  %689 = vmatprep.subr.bf16.mxu1 %v923_v0  ;;  %v609_v54 = vld [vmem:[%s1069_s6] ss:$0 sm:$0xff]  ;;  %s576_s6 = sshll.u32 %s925_s16, 4  ;;  %s577_s6 = int_to_ptr.vmem [resolvable:$true] %s576_s6 }
  0x49   :  { %s888_s17 = scalar_lea.vmem %s577_s6, 256  ;;  %p893_p12 = scmp.lt.s32.totalorder %s577_s6, %s577_s6 }
  0x4a   :  { %p889_p11 = scmp.ne.s32.totalorder %s577_s6, %s888_s17  ;;  %p894_p13 = scmp.lt.s32.totalorder %s888_s17, %s888_s17 }
  0x4b   :  { %670 = vmatpush3.bf16.msra.mxu0 %v758_v5  ;;  %690 = vmatpush3.bf16.msra.mxu1 %v767_v10 }
  0x4c   :  { %671 = vmatprep.subr.bf16.mxu0 %v923_v0  ;;  %691 = vmatprep.subr.bf16.mxu1 %v923_v0  ;;  %p895_p0 = por %p894_p13, %p893_p12 }
  0x4e   :  { %p896_p1 = pnand %p895_p0, %p889_p11 }
  0x4f   :  { %672 = vmatpush3.bf16.msra.mxu0 %v759_v7  ;;  %692 = vmatpush3.bf16.msra.mxu1 %v768_v12 }
  0x50   :  { %673 = vmatprep.subr.bf16.mxu0 %v923_v0  ;;  %693 = vmatprep.subr.bf16.mxu1 %v923_v0 }
  0x53   :  { %674 = vmatpush3.bf16.msra.mxu0 %v760_v9  ;;  %694 = vmatpush3.bf16.msra.mxu1 %v769_v15 }
  0x54   :  { %675 = vmatprep.subr.bf16.mxu0 %v923_v0  ;;  %695 = vmatprep.subr.bf16.mxu1 %v923_v0 }
  0x57   :  { %676 = vmatpush3.bf16.msra.mxu0 %v761_v11  ;;  %696 = vmatpush3.bf16.msra.mxu1 %v770_v16 }
  0x58   :  { %677 = vmatprep.subr.bf16.mxu0 %v923_v0  ;;  %697 = vmatprep.subr.bf16.mxu1 %v923_v0 }
  0x5b   :  { %678 = vmatpush3.bf16.msra.mxu0 %v762_v13  ;;  %698 = vmatpush3.bf16.msra.mxu1 %v771_v17 }
  0x5c   :  { %703 = vmatprep.subr.bf16.mxu0 %v923_v0  ;;  %723 = vmatprep.subr.bf16.mxu1 %v923_v0 }
  0x5e   :  { %680 = vmatmul.mubr.bf16.vlgmr.msra.gmra.mxu0 %v763_v14 }
  0x5f   :  { %719 = vmatprep.mubr.msk.bf16.mxu0 %vm924_vm0, %v923_v0  ;;  %704 = vmatpush3.bf16.msra.mxu0 %v772_v18 }
  0x60   :  { %705 = vmatprep.subr.bf16.mxu0 %v923_v0 }
  0x63   :  { %706 = vmatpush3.bf16.msra.mxu0 %v773_v19 }
  0x64   :  { %707 = vmatprep.subr.bf16.mxu0 %v923_v0 }
  0x67   :  { %708 = vmatpush3.bf16.msra.mxu0 %v774_v20 }
  0x68   :  { %709 = vmatprep.subr.bf16.mxu0 %v923_v0 }
  0x6b   :  { %710 = vmatpush3.bf16.msra.mxu0 %v775_v21 }
  0x6c   :  { %711 = vmatprep.subr.bf16.mxu0 %v923_v0 }
  0x6f   :  { %712 = vmatpush3.bf16.msra.mxu0 %v776_v22 }
  0x70   :  { %713 = vmatprep.subr.bf16.mxu0 %v923_v0 }
  0x73   :  { %714 = vmatpush3.bf16.msra.mxu0 %v777_v33 }
  0x74   :  { %715 = vmatprep.subr.bf16.mxu0 %v923_v0 }
  0x77   :  { %716 = vmatpush3.bf16.msra.mxu0 %v778_v34 }
  0x78   :  { %717 = vmatprep.subr.bf16.mxu0 %v923_v0 }
  0x7b   :  { %718 = vmatpush3.bf16.msra.mxu0 %v779_v35 }
 0x11e   :  { %v215_v24 = vpop.f32.mrf.mxu0 }
 0x11f   :  { %v216_v26 = vadd.f32 %v590_v23, %v215_v24 }
 0x120   :  { %v681_v25 = vpop.f32.mrf.mxu0 }
 0x121   :  { %v222_v30 = vmax.f32 %v216_v26, 0.0 }
 0x122   :  { %v218_v27 = vpop.f32.mrf.mxu0 }
 0x123   :  { %v219_v28 = vadd.f32 %v590_v23, %v218_v27 }
 0x124   :  { %v682_v29 = vpop.f32.mrf.mxu0 }
 0x125   :  { %v223_v31 = vmax.f32 %v219_v28, 0.0 }
 0x127   :  { %v241_v32 = vpack.c.bf16 %v223_v31, %v222_v30 }
 0x129   :  { %700 = vmatmul.mubr.bf16.vlgmr.msra.gmra.mxu1 %v241_v32 }
 0x12a   :  { %739 = vmatprep.mubr.msk.bf16.mxu1 %vm924_vm0, %v923_v0  ;;  %724 = vmatpush3.bf16.msra.mxu1 %v780_v36 }
 0x12b   :  { %725 = vmatprep.subr.bf16.mxu1 %v923_v0 }
 0x12e   :  { %726 = vmatpush3.bf16.msra.mxu1 %v781_v37 }
 0x12f   :  { %727 = vmatprep.subr.bf16.mxu1 %v923_v0 }
 0x132   :  { %728 = vmatpush3.bf16.msra.mxu1 %v782_v38 }
 0x133   :  { %729 = vmatprep.subr.bf16.mxu1 %v923_v0 }
 0x136   :  { %730 = vmatpush3.bf16.msra.mxu1 %v783_v39 }
 0x137   :  { %731 = vmatprep.subr.bf16.mxu1 %v923_v0 }
 0x13a   :  { %732 = vmatpush3.bf16.msra.mxu1 %v784_v40 }
 0x13b   :  { %733 = vmatprep.subr.bf16.mxu1 %v923_v0 }
 0x13e   :  { %734 = vmatpush3.bf16.msra.mxu1 %v785_v51 }
 0x13f   :  { %735 = vmatprep.subr.bf16.mxu1 %v923_v0 }
 0x142   :  { %736 = vmatpush3.bf16.msra.mxu1 %v786_v52 }
 0x143   :  { %737 = vmatprep.subr.bf16.mxu1 %v923_v0  ;;  %v618_v0 = vld [vmem:[%s1071_s8] ss:$0 sm:$0xff] }
 0x146   :  { %738 = vmatpush3.bf16.msra.mxu1 %v787_v53 }
 0x1e9   :  { %v330_v42 = vpop.f32.mrf.mxu1 }
 0x1ea   :  { %v331_v44 = vadd.f32 %v600_v41, %v330_v42 }
 0x1eb   :  { %v701_v43 = vpop.f32.mrf.mxu1 }
 0x1ec   :  { %v337_v48 = vmax.f32 %v331_v44, 0.0 }
 0x1ed   :  { %v333_v45 = vpop.f32.mrf.mxu1 }
 0x1ee   :  { %v334_v46 = vadd.f32 %v600_v41, %v333_v45 }
 0x1ef   :  { %v702_v47 = vpop.f32.mrf.mxu1 }
 0x1f0   :  { %v338_v49 = vmax.f32 %v334_v46, 0.0 }
 0x1f2   :  { %v356_v50 = vpack.c.bf16 %v338_v49, %v337_v48 }
 0x1f4   :  { %720 = vmatmul.mubr.bf16.vlgmr.msra.gmra.mxu0 %v356_v50 }
 0x2b4   :  { %v445_v55 = vpop.f32.mrf.mxu0 }
 0x2b5   :  { %v446_v57 = vadd.f32 %v609_v54, %v445_v55 }
 0x2b6   :  { %v721_v56 = vpop.f32.mrf.mxu0 }
 0x2b7   :  { %v452_v61 = vmax.f32 %v446_v57, 0.0 }
 0x2b8   :  { %v448_v58 = vpop.f32.mrf.mxu0 }
 0x2b9   :  { %v449_v59 = vadd.f32 %v609_v54, %v448_v58 }
 0x2ba   :  { %v722_v60 = vpop.f32.mrf.mxu0 }
 0x2bb   :  { %v453_v62 = vmax.f32 %v449_v59, 0.0 }
 0x2bd   :  { %v471_v63 = vpack.c.bf16 %v453_v62, %v452_v61 }
 0x2bf   :  { %740 = vmatmul.mubr.bf16.vlgmr.msra.gmra.mxu1 %v471_v63 }
 0x37f   :  { %v560_v1 = vpop.f32.mrf.mxu1 }
 0x380   :  { %v561_v2 = vadd.f32 %v618_v0, %v560_v1 }
 0x381   :  { %v741_v3 = vpop.f32.mrf.mxu1 }
 0x382   :  { %v567_v4 = vand.u32 2147483647, %v561_v2 }
 0x383   :  { %v563_v5 = vpop.f32.mrf.mxu1 }
 0x384   :  { %569 = vst [vmem:[#allocation11] sm:$0xff] %v567_v4  ;;  %v564_v6 = vadd.f32 %v618_v0, %v563_v5 }
 0x385   :  { %v742_v7 = vpop.f32.mrf.mxu1 }
 0x386   :  { %v568_v8 = vand.u32 2147483647, %v564_v6 }
 0x388   :  { %570 = vst [vmem:[#allocation11 + $0x8] sm:$0xff] %v568_v8 }
 0x389   :  { %899 = shalt.err (!%p896_p1)
}
 0x38a   :  { %s926_s8 = smov 128   ;;  %s927_s18 = smov 8  }
 0x38b   :  { %582 = dma.vmem_to_hbm [thread:$0]  %s577_s6, 256, %s1072_s9, [#allocation4], %s926_s8, %s926_s8, %s927_s18  }
 0x38c   :  { %914 = dma.done.wait [#allocation4], 256  }
 0x38d   :  { %915 = vsyncadd [#allocation4], 4294967040 }
 0x38e   :  { %586 = vsyncpa [#allocation3], 1 }
 0x38f   :  { %587 = vsyncpa [#allocation6], 1 }
 0x390   :  { %588 = vsyncpa [#allocation9], 1 }
 0x391   :  { %589 = vsyncpa [#allocation4], 1 }

</bundles_post_ra>
